<compile_context>
chip_gen: v6e
topology: v6e:2x2x1
jax: 0.10.0
libtpu: 0.0.40
codegen_flags: <defaults>
</compile_context>

<pallas_src>
import jax
import jax.numpy as jnp
from jax.experimental import pallas as pl
from jax.experimental.pallas import tpu as pltpu

D_TXT = 768
D_IMG = 1000
D_HID = 128
D_OUT = 3
D_OUT_PAD = 128   # lane-padded final-weight width; kernel slices [:, :3]


def _round_up(x, m):
    return (x + m - 1) // m * m


def _fused_head_kernel(txt_ref, img_ref,
                       wt_ref, bt_ref,
                       wi_ref, bi_ref,
                       wft_ref, wfi_ref, bf_ref,
                       out_ref):
    # Activations arrive f32 straight from HBM; cast to bf16 in-register so the
    # wrapper never materializes a padded/cast copy of them.
    t_in = txt_ref[...].astype(jnp.bfloat16)              # [tb, 768]
    i_in = img_ref[...].astype(jnp.bfloat16)              # [tb, 1000]

    # First-stage linears; f32 accumulation on the MXU.
    t = jnp.dot(t_in, wt_ref[...],
                preferred_element_type=jnp.float32) + bt_ref[...]   # [tb,128]
    i = jnp.dot(i_in, wi_ref[...],
                preferred_element_type=jnp.float32) + bi_ref[...]   # [tb,128]

    # relu(cat(t, i)) == cat(relu(t), relu(i)), and
    # fc(cat(a, b)) == a @ Wf_top + b @ Wf_bot + bf  ->  no concat needed.
    t = jnp.maximum(t, 0.0).astype(jnp.bfloat16)
    i = jnp.maximum(i, 0.0).astype(jnp.bfloat16)

    out = (jnp.dot(t, wft_ref[...], preferred_element_type=jnp.float32)
           + jnp.dot(i, wfi_ref[...], preferred_element_type=jnp.float32)
           + bf_ref[...])                                  # [tb, 128] lane-padded
    out_ref[...] = out[:, :D_OUT].astype(out_ref.dtype)    # (tb, 3) store


def prepare_head_params(params):
    """One-time pad/cast of the head weights (hoisted out of the hot path)."""
    wf = params["wf"]                                       # [256, 3]
    pad = ((0, 0), (0, D_OUT_PAD - D_OUT))
    return {
        "wt":  params["wt"].astype(jnp.bfloat16),                        # [768,128]
        "bt":  params["bt"].reshape(1, D_HID).astype(jnp.float32),       # [1,128]
        "wi":  params["wi"].astype(jnp.bfloat16),                        # [1000,128]
        "bi":  params["bi"].reshape(1, D_HID).astype(jnp.float32),       # [1,128]
        "wft": jnp.pad(wf[:D_HID], pad).astype(jnp.bfloat16),            # [128,128]
        "wfi": jnp.pad(wf[D_HID:], pad).astype(jnp.bfloat16),            # [128,128]
        "bf":  jnp.pad(params["bf"].reshape(1, D_OUT), pad
                       ).astype(jnp.float32),                            # [1,128]
    }


def _choose_tile_b(B, tile_b):
    """Multiple-of-8 batch tile; aim for >=2 grid steps (v7x dual-TC sharding)."""
    if B <= 8:
        return 8
    return min(tile_b, _round_up(pl.cdiv(B, 2), 8))


def bert_res_early_head(txt_feat, img_feat, prepared, *, tile_b=2048):
    """Fusion head of BertResEarly as one batch-tiled Pallas call.

    txt_feat: [B, 768]  float32  (BERT CLS hidden state)
    img_feat: [B, 1000] float32  (ResNet152 logits)
    returns:  [B, 3]    float32
    """
    B = txt_feat.shape[0]
    tb = _choose_tile_b(B, tile_b)
    grid = (pl.cdiv(B, tb),)

    res = lambda shape: pl.BlockSpec(shape, lambda b: (0, 0))   # VMEM-resident

    in_specs = [
        pl.BlockSpec((tb, D_TXT), lambda b: (b, 0)),    # txt tile (f32)
        pl.BlockSpec((tb, D_IMG), lambda b: (b, 0)),    # img tile (f32, full 1000)
        res((D_TXT, D_HID)),                            # wt
        res((1, D_HID)),                                # bt
        res((D_IMG, D_HID)),                            # wi
        res((1, D_HID)),                                # bi
        res((D_HID, D_OUT_PAD)),                        # wf top half (lane-padded)
        res((D_HID, D_OUT_PAD)),                        # wf bottom half
        res((1, D_OUT_PAD)),                            # bf (lane-padded)
    ]
    out_specs = pl.BlockSpec((tb, D_OUT), lambda b: (b, 0))

    flops = 2 * B * (D_TXT + D_IMG) * D_HID + 2 * B * (2 * D_HID) * D_OUT
    bytes_accessed = (
        B * (D_TXT + D_IMG) * 4                       # f32 activations, read once
        + (D_TXT + D_IMG) * D_HID * 2                 # bf16 stage-1 weights
        + 2 * D_HID * D_OUT_PAD * 2                   # bf16 final weight halves
        + (2 * D_HID + D_OUT_PAD) * 4                 # f32 biases
        + B * D_OUT * 4                               # f32 output
    )
    cost = pl.CostEstimate(flops=int(flops), transcendentals=0,
                           bytes_accessed=int(bytes_accessed))

    return pl.pallas_call(
        _fused_head_kernel,
        out_shape=jax.ShapeDtypeStruct((B, D_OUT), jnp.float32),
        grid=grid,
        in_specs=in_specs,
        out_specs=out_specs,
        compiler_params=pltpu.CompilerParams(
            dimension_semantics=("parallel",),
            # tile_b=2048 f32 activations double-buffered + resident weights
            # ~31 MiB; 48 MiB leaves headroom and stays within v7x's 64 MiB
            # physical VMEM (v5e/v6e have 128 MiB physical).
            vmem_limit_bytes=48 * 1024 * 1024,
        ),
        cost_estimate=cost,
    )(txt_feat, img_feat,
      prepared["wt"], prepared["bt"],
      prepared["wi"], prepared["bi"],
      prepared["wft"], prepared["wfi"], prepared["bf"])


def init_params(key):
    """Deterministic init matching the nn.Linear shapes of BertResEarly."""
    ks = jax.random.split(key, 6)
    scale = 0.02
    return {
        # t_linear: 768 -> 128   (stored [in, out]: y = x @ W + b)
        "wt": scale * jax.random.normal(ks[0], (768, 128), jnp.float32),
        "bt": scale * jax.random.normal(ks[1], (128,), jnp.float32),
        # i_linear: 1000 -> 128
        "wi": scale * jax.random.normal(ks[2], (1000, 128), jnp.float32),
        "bi": scale * jax.random.normal(ks[3], (128,), jnp.float32),
        # fc: 256 -> 3
        "wf": scale * jax.random.normal(ks[4], (256, 3), jnp.float32),
        "bf": scale * jax.random.normal(ks[5], (3,), jnp.float32),
    }


def _reference(txt_feat, img_feat, p):
    t = txt_feat @ p["wt"] + p["bt"]
    i = img_feat @ p["wi"] + p["bi"]
    r = jnp.maximum(jnp.concatenate([t, i], axis=-1), 0.0)
    return r @ p["wf"] + p["bf"]


if __name__ == "__main__":
    key = jax.random.PRNGKey(0)
    k_txt, k_img, k_par = jax.random.split(key, 3)

    B = 2
    # Stand-ins for the (untranslated) backbone outputs:
    #   bert(...).last_hidden_state[:, 0, :] -> [B, 768]
    #   resnet152(image)                     -> [B, 1000]
    txt_feat = jax.random.normal(k_txt, (B, 768), jnp.float32)
    img_feat = jax.random.normal(k_img, (B, 1000), jnp.float32)

    params = init_params(k_par)
    prepared = prepare_head_params(params)

    out = bert_res_early_head(txt_feat, img_feat, prepared)
    out = jax.block_until_ready(out)

    ref = _reference(txt_feat, img_feat, params)
    assert out.shape == (B, 3), out.shape
    # bf16 inputs/weights with f32 accumulation: small deviation expected.
    assert jnp.allclose(out, ref, atol=2e-2, rtol=2e-2), (
        f"max err {jnp.max(jnp.abs(out - ref))}")

    print("KERNEL_OK")
</pallas_src>

<mosaic_0001>
module attributes {stable_mosaic.version = 11 : i64} {
  func.func @_fused_head_kernel(%arg0: i32, %arg1: memref<8x768xf32, #tpu.memory_space<vmem>>, %arg2: memref<8x1000xf32, #tpu.memory_space<vmem>>, %arg3: memref<768x128xbf16, #tpu.memory_space<vmem>>, %arg4: memref<1x128xf32, #tpu.memory_space<vmem>>, %arg5: memref<1000x128xbf16, #tpu.memory_space<vmem>>, %arg6: memref<1x128xf32, #tpu.memory_space<vmem>>, %arg7: memref<128x128xbf16, #tpu.memory_space<vmem>>, %arg8: memref<128x128xbf16, #tpu.memory_space<vmem>>, %arg9: memref<1x128xf32, #tpu.memory_space<vmem>>, %arg10: memref<8x3xf32, #tpu.memory_space<vmem>>) attributes {dimension_semantics = [#tpu.dimension_semantics<parallel>], iteration_bounds = array<i64: 1>, scalar_prefetch = 0 : i64, scratch_operands = 0 : i64, tpu.core_type = #tpu.core_type<tc>, window_params = [{transform_indices = @transform_0, window_bounds = array<i64: 8, 768>}, {transform_indices = @transform_1, window_bounds = array<i64: 8, 1000>}, {pipeline_mode = #tpu.pipeline_mode<synchronous>, transform_indices = @transform_2, window_bounds = array<i64: 768, 128>}, {pipeline_mode = #tpu.pipeline_mode<synchronous>, transform_indices = @transform_3, window_bounds = array<i64: 1, 128>}, {pipeline_mode = #tpu.pipeline_mode<synchronous>, transform_indices = @transform_4, window_bounds = array<i64: 1000, 128>}, {pipeline_mode = #tpu.pipeline_mode<synchronous>, transform_indices = @transform_5, window_bounds = array<i64: 1, 128>}, {pipeline_mode = #tpu.pipeline_mode<synchronous>, transform_indices = @transform_6, window_bounds = array<i64: 128, 128>}, {pipeline_mode = #tpu.pipeline_mode<synchronous>, transform_indices = @transform_7, window_bounds = array<i64: 128, 128>}, {pipeline_mode = #tpu.pipeline_mode<synchronous>, transform_indices = @transform_8, window_bounds = array<i64: 1, 128>}, {transform_indices = @transform_9, window_bounds = array<i64: 8, 3>}]} {
    %c0 = arith.constant 0 : index
    %c0_0 = arith.constant 0 : index
    %0 = vector.load %arg1[%c0, %c0_0] : memref<8x768xf32, #tpu.memory_space<vmem>>, vector<8x768xf32>
    %1 = arith.truncf %0 : vector<8x768xf32> to vector<8x768xbf16>
    %c0_1 = arith.constant 0 : index
    %c0_2 = arith.constant 0 : index
    %2 = vector.load %arg2[%c0_1, %c0_2] : memref<8x1000xf32, #tpu.memory_space<vmem>>, vector<8x1000xf32>
    %3 = arith.truncf %2 : vector<8x1000xf32> to vector<8x1000xbf16>
    %c0_3 = arith.constant 0 : index
    %c0_4 = arith.constant 0 : index
    %4 = vector.load %arg3[%c0_3, %c0_4] : memref<768x128xbf16, #tpu.memory_space<vmem>>, vector<768x128xbf16>
    %cst = arith.constant dense<0.000000e+00> : vector<8x128xf32>
    %5 = tpu.matmul %1, %4, %cst {dimension_numbers = #tpu.dot_dimension_numbers<[1], [0], [0], [1], [0, 0, 1, 1], [], []>} : vector<8x768xbf16>, vector<768x128xbf16>, vector<8x128xf32> -> vector<8x128xf32>
    %c0_5 = arith.constant 0 : index
    %c0_6 = arith.constant 0 : index
    %6 = vector.load %arg4[%c0_5, %c0_6] : memref<1x128xf32, #tpu.memory_space<vmem>>, vector<1x128xf32>
    %7 = vector.broadcast %6 : vector<1x128xf32> to vector<8x128xf32>
    %8 = arith.addf %5, %7 : vector<8x128xf32>
    %c0_7 = arith.constant 0 : index
    %c0_8 = arith.constant 0 : index
    %9 = vector.load %arg5[%c0_7, %c0_8] : memref<1000x128xbf16, #tpu.memory_space<vmem>>, vector<1000x128xbf16>
    %cst_9 = arith.constant dense<0.000000e+00> : vector<8x128xf32>
    %10 = tpu.matmul %3, %9, %cst_9 {dimension_numbers = #tpu.dot_dimension_numbers<[1], [0], [0], [1], [0, 0, 1, 1], [], []>} : vector<8x1000xbf16>, vector<1000x128xbf16>, vector<8x128xf32> -> vector<8x128xf32>
    %c0_10 = arith.constant 0 : index
    %c0_11 = arith.constant 0 : index
    %11 = vector.load %arg6[%c0_10, %c0_11] : memref<1x128xf32, #tpu.memory_space<vmem>>, vector<1x128xf32>
    %12 = vector.broadcast %11 : vector<1x128xf32> to vector<8x128xf32>
    %13 = arith.addf %10, %12 : vector<8x128xf32>
    %cst_12 = arith.constant 0.000000e+00 : f32
    %14 = vector.broadcast %cst_12 : f32 to vector<8x128xf32>
    %15 = arith.maximumf %8, %14 : vector<8x128xf32>
    %16 = arith.truncf %15 : vector<8x128xf32> to vector<8x128xbf16>
    %cst_13 = arith.constant 0.000000e+00 : f32
    %17 = vector.broadcast %cst_13 : f32 to vector<8x128xf32>
    %18 = arith.maximumf %13, %17 : vector<8x128xf32>
    %19 = arith.truncf %18 : vector<8x128xf32> to vector<8x128xbf16>
    %c0_14 = arith.constant 0 : index
    %c0_15 = arith.constant 0 : index
    %20 = vector.load %arg7[%c0_14, %c0_15] : memref<128x128xbf16, #tpu.memory_space<vmem>>, vector<128x128xbf16>
    %cst_16 = arith.constant dense<0.000000e+00> : vector<8x128xf32>
    %21 = tpu.matmul %16, %20, %cst_16 {dimension_numbers = #tpu.dot_dimension_numbers<[1], [0], [0], [1], [0, 0, 1, 1], [], []>} : vector<8x128xbf16>, vector<128x128xbf16>, vector<8x128xf32> -> vector<8x128xf32>
    %c0_17 = arith.constant 0 : index
    %c0_18 = arith.constant 0 : index
    %22 = vector.load %arg8[%c0_17, %c0_18] : memref<128x128xbf16, #tpu.memory_space<vmem>>, vector<128x128xbf16>
    %cst_19 = arith.constant dense<0.000000e+00> : vector<8x128xf32>
    %23 = tpu.matmul %19, %22, %cst_19 {dimension_numbers = #tpu.dot_dimension_numbers<[1], [0], [0], [1], [0, 0, 1, 1], [], []>} : vector<8x128xbf16>, vector<128x128xbf16>, vector<8x128xf32> -> vector<8x128xf32>
    %24 = arith.addf %21, %23 : vector<8x128xf32>
    %c0_20 = arith.constant 0 : index
    %c0_21 = arith.constant 0 : index
    %25 = vector.load %arg9[%c0_20, %c0_21] : memref<1x128xf32, #tpu.memory_space<vmem>>, vector<1x128xf32>
    %26 = vector.broadcast %25 : vector<1x128xf32> to vector<8x128xf32>
    %27 = arith.addf %24, %26 : vector<8x128xf32>
    %28 = vector.extract_strided_slice %27 {offsets = [0, 0], sizes = [8, 3], strides = [1, 1]} : vector<8x128xf32> to vector<8x3xf32>
    %c0_22 = arith.constant 0 : index
    %c0_23 = arith.constant 0 : index
    %29 = vector.load %arg10[%c0_22, %c0_23] : memref<8x3xf32, #tpu.memory_space<vmem>>, vector<8x3xf32>
    tpu.vector_store %arg10[%c0_22, %c0_23], %28 {strides = array<i32>} : memref<8x3xf32, #tpu.memory_space<vmem>>, vector<8x3xf32>,
    return
  }
  func.func @transform_0(%arg0: i32) -> (i32, i32) {
    %c0_i32 = arith.constant 0 : i32
    %c0_i32_0 = arith.constant 0 : i32
    return %arg0, %c0_i32 : i32, i32
  }
  func.func @transform_1(%arg0: i32) -> (i32, i32) {
    %c0_i32 = arith.constant 0 : i32
    %c0_i32_0 = arith.constant 0 : i32
    return %arg0, %c0_i32 : i32, i32
  }
  func.func @transform_2(%arg0: i32) -> (i32, i32) {
    %c0_i32 = arith.constant 0 : i32
    %c0_i32_0 = arith.constant 0 : i32
    %c0_i32_1 = arith.constant 0 : i32
    return %c0_i32, %c0_i32_0 : i32, i32
  }
  func.func @transform_3(%arg0: i32) -> (i32, i32) {
    %c0_i32 = arith.constant 0 : i32
    %c0_i32_0 = arith.constant 0 : i32
    %c0_i32_1 = arith.constant 0 : i32
    return %c0_i32, %c0_i32_0 : i32, i32
  }
  func.func @transform_4(%arg0: i32) -> (i32, i32) {
    %c0_i32 = arith.constant 0 : i32
    %c0_i32_0 = arith.constant 0 : i32
    %c0_i32_1 = arith.constant 0 : i32
    return %c0_i32, %c0_i32_0 : i32, i32
  }
  func.func @transform_5(%arg0: i32) -> (i32, i32) {
    %c0_i32 = arith.constant 0 : i32
    %c0_i32_0 = arith.constant 0 : i32
    %c0_i32_1 = arith.constant 0 : i32
    return %c0_i32, %c0_i32_0 : i32, i32
  }
  func.func @transform_6(%arg0: i32) -> (i32, i32) {
    %c0_i32 = arith.constant 0 : i32
    %c0_i32_0 = arith.constant 0 : i32
    %c0_i32_1 = arith.constant 0 : i32
    return %c0_i32, %c0_i32_0 : i32, i32
  }
  func.func @transform_7(%arg0: i32) -> (i32, i32) {
    %c0_i32 = arith.constant 0 : i32
    %c0_i32_0 = arith.constant 0 : i32
    %c0_i32_1 = arith.constant 0 : i32
    return %c0_i32, %c0_i32_0 : i32, i32
  }
  func.func @transform_8(%arg0: i32) -> (i32, i32) {
    %c0_i32 = arith.constant 0 : i32
    %c0_i32_0 = arith.constant 0 : i32
    %c0_i32_1 = arith.constant 0 : i32
    return %c0_i32, %c0_i32_0 : i32, i32
  }
  func.func @transform_9(%arg0: i32) -> (i32, i32) {
    %c0_i32 = arith.constant 0 : i32
    %c0_i32_0 = arith.constant 0 : i32
    return %arg0, %c0_i32 : i32, i32
  }
}

</mosaic_0001>

<bundles_post_ra>
// kernel: tpu_custom_call.1
= control target key start
LH: loop header
LB: loop body
LE: loop exit
PB: predicated region body
PF: predicated region fallthrough
CT: control target
= control target key end

     0   :  { %14 = vsyncpa [#allocation3], 0  ;;  %s2529_s0 = inlined_call_operand.hbm [shape: f32[2,768], index: 0, kind: input, shape index: {}]   ;;  %s2530_s1 = inlined_call_operand.hbm [shape: f32[2,1000], index: 1, kind: input, shape index: {}]   ;;  %s2531_s2 = inlined_call_operand.hbm [shape: bf16[768,128], index: 2, kind: input, shape index: {}]   ;;  %s2532_s3 = inlined_call_operand.vmem [shape: f32[1,128], index: 3, kind: input, shape index: {}]   ;;  %s2533_s4 = inlined_call_operand.hbm [shape: bf16[1000,128], index: 4, kind: input, shape index: {}]   ;;  %s2534_s5 = inlined_call_operand.vmem [shape: f32[1,128], index: 5, kind: input, shape index: {}]   ;;  %s2535_s6 = inlined_call_operand.hbm [shape: bf16[128,128], index: 6, kind: input, shape index: {}]   ;;  %s2536_s7 = inlined_call_operand.hbm [shape: bf16[128,128], index: 7, kind: input, shape index: {}]   ;;  %s2537_s8 = inlined_call_operand.vmem [shape: f32[1,128], index: 8, kind: input, shape index: {}]   ;;  %s2538_s9 = inlined_call_operand.hbm [shape: f32[2,3], index: 9, kind: output, shape index: {}]  }
   0x1   :  { %15 = vsyncpa [#allocation6], 0 }
   0x2   :  { %16 = vsyncpa [#allocation9], 0 }
   0x3   :  { %17 = vsyncpa [#allocation12], 0 }
   0x4   :  { %18 = vsyncpa [#allocation4], 0 }
   0x5   :  { %23 = vsyncadd [#allocation3], 576  ;;  %s2367_s30 = smov [#allocation2]  }
   0x6   :  { %s24_s10 = sshll.u32 %s2367_s30, 4  ;;  %s25_s10 = int_to_ptr.vmem [resolvable:$true] %s24_s10 }
   0x7   :  { %s2225_s11 = scalar_lea.vmem %s25_s10, 192  ;;  %s2229_s12 = scalar_lea.vmem %s25_s10, 768 }
   0x8   :  { %p2226_p0 = scmp.ne.s32.totalorder %s25_s10, %s2225_s11  ;;  %p2230_p1 = scmp.lt.s32.totalorder %s25_s10, %s25_s10 }
   0x9   :  { %p2231_p2 = scmp.lt.s32.totalorder %s2229_s12, %s2225_s11 }
   0xb   :  { %p2232_p3 = por %p2231_p2, %p2230_p1 }
   0xd   :  { %p2233_p4 = pnand %p2232_p3, %p2226_p0 }
   0xf   :  { %2236 = shalt.err (!%p2233_p4)
}
  0x10   :  { %s2368_s13 = smov 192   ;;  %s2369_s14 = smov 12  }
  0x11   :  { %30 = dma.hbm_to_vmem [thread:$0]  %s2529_s0, 192, %s25_s10, [#allocation3], %s2368_s13, %s2368_s13, %s2369_s14  }
  0x12   :  { %35 = vsyncadd [#allocation6], 768  ;;  %s2370_s17 = smov [#allocation5]  }
  0x13   :  { %s36_s18 = sshll.u32 %s2370_s17, 4  ;;  %s37_s18 = int_to_ptr.vmem [resolvable:$true] %s36_s18 }
  0x14   :  { %s2245_s19 = scalar_lea.vmem %s37_s18, 256  ;;  %s2249_s20 = scalar_lea.vmem %s37_s18, 1024 }
  0x15   :  { %p2246_p5 = scmp.ne.s32.totalorder %s37_s18, %s2245_s19  ;;  %p2250_p6 = scmp.lt.s32.totalorder %s37_s18, %s37_s18 }
  0x16   :  { %p2251_p7 = scmp.lt.s32.totalorder %s2249_s20, %s2245_s19 }
  0x18   :  { %p2252_p8 = por %p2251_p7, %p2250_p6 }
  0x1a   :  { %p2253_p9 = pnand %p2252_p8, %p2246_p5 }
  0x1c   :  { %2256 = shalt.err (!%p2253_p9)
}
  0x1d   :  { %s2371_s21 = smov 256   ;;  %s2372_s22 = smov 16  }
  0x1e   :  { %42 = dma.hbm_to_vmem [thread:$0]  %s2530_s1, 256, %s37_s18, [#allocation6], %s2371_s21, %s2371_s21, %s2372_s22  }
  0x1f   :  { %s2373_s25 = smov [#allocation8]   ;;  %s2374_s26 = smov [#allocation7]  }
  0x20   :  { %s62_s0 = sshll.u32 %s2373_s25, 4  ;;  %s48_s27 = sshll.u32 %s2374_s26, 4  ;;  %s63_s0 = int_to_ptr.vmem [resolvable:$true] %s62_s0  ;;  %s49_s27 = int_to_ptr.vmem [resolvable:$true] %s48_s27 }
  0x21   :  { %s2265_s28 = scalar_lea.vmem %s63_s0, 8000  ;;  %p2270_p11 = scmp.lt.s32.totalorder %s63_s0, %s63_s0 }
  0x22   :  { %p2266_p10 = scmp.ne.s32.totalorder %s63_s0, %s2265_s28  ;;  %p2271_p12 = scmp.lt.s32.totalorder %s2265_s28, %s2265_s28 }
  0x24   :  { %p2272_p13 = por %p2271_p12, %p2270_p11 }
  0x26   :  { %p2273_p0 = pnand %p2272_p13, %p2266_p10 }
  0x28   :  { %2276 = shalt.err (!%p2273_p0)
}
  0x29   :  { %s2375_s29 = smov 64   ;;  %s2376_s30 = smov 4  }
  0x2a   :  { %68 = dma.hbm_to_vmem [thread:$0]  %s2533_s4, 8000, %s63_s0, [#allocation9], %s2375_s29, %s2375_s29, %s2376_s30  }
  0x2b   :  { %s2285_s1 = scalar_lea.vmem %s49_s27, 6144  ;;  %p2290_p2 = scmp.lt.s32.totalorder %s49_s27, %s49_s27 }
  0x2c   :  { %p2286_p1 = scmp.ne.s32.totalorder %s49_s27, %s2285_s1  ;;  %p2291_p3 = scmp.lt.s32.totalorder %s2285_s1, %s2285_s1 }
  0x2e   :  { %p2292_p4 = por %p2291_p3, %p2290_p2 }
  0x30   :  { %p2293_p5 = pnand %p2292_p4, %p2286_p1 }
  0x32   :  { %2296 = shalt.err (!%p2293_p5)
}
  0x33   :  { %54 = dma.hbm_to_vmem [thread:$0]  %s2531_s2, 6144, %s49_s27, [#allocation6], %s2375_s29, %s2375_s29, %s2376_s30  }
  0x34   :  { %s2377_s14 = smov [#allocation10]   ;;  %s2378_s16 = smov [#allocation11]  }
  0x35   :  { %s76_s15 = sshll.u32 %s2377_s14, 4  ;;  %s88_s4 = sshll.u32 %s2378_s16, 4  ;;  %s77_s15 = int_to_ptr.vmem [resolvable:$true] %s76_s15  ;;  %s89_s4 = int_to_ptr.vmem [resolvable:$true] %s88_s4 }
  0x36   :  { %s2305_s17 = scalar_lea.vmem %s77_s15, 1024  ;;  %p2310_p7 = scmp.lt.s32.totalorder %s77_s15, %s77_s15 }
  0x37   :  { %p2306_p6 = scmp.ne.s32.totalorder %s77_s15, %s2305_s17  ;;  %p2311_p8 = scmp.lt.s32.totalorder %s2305_s17, %s2305_s17 }
  0x39   :  { %p2312_p9 = por %p2311_p8, %p2310_p7 }
  0x3b   :  { %p2313_p10 = pnand %p2312_p9, %p2306_p6 }
  0x3d   :  { %2316 = shalt.err (!%p2313_p10)
}
  0x3e   :  { %82 = dma.hbm_to_vmem [thread:$0]  %s2535_s6, 1024, %s77_s15, [#allocation9], %s2375_s29, %s2375_s29, %s2376_s30  }
  0x3f   :  { %s2325_s2 = scalar_lea.vmem %s89_s4, 1024  ;;  %p2330_p12 = scmp.lt.s32.totalorder %s89_s4, %s89_s4 }
  0x40   :  { %p2326_p11 = scmp.ne.s32.totalorder %s89_s4, %s2325_s2  ;;  %p2331_p13 = scmp.lt.s32.totalorder %s2325_s2, %s2325_s2 }
  0x42   :  { %p2332_p0 = por %p2331_p13, %p2330_p12 }
  0x44   :  { %p2333_p1 = pnand %p2332_p0, %p2326_p11 }
  0x46   :  { %2336 = shalt.err (!%p2333_p1)
}
  0x47   :  { %94 = dma.hbm_to_vmem [thread:$0]  %s2536_s7, 1024, %s89_s4, [#allocation12], %s2375_s29, %s2375_s29, %s2376_s30  }
  0x48   :  { %2357 = dma.done.wait [#allocation3], 768  }
  0x49   :  { %2358 = vsyncadd [#allocation3], 4294966528 }
  0x4a   :  { %2359 = dma.done.wait [#allocation6], 7168  }
  0x4b   :  { %2360 = vsyncadd [#allocation6], 4294960128 }
  0x4c   :  { %2361 = dma.done.wait [#allocation9], 9024  }
  0x4d   :  { %2362 = vsyncadd [#allocation9], 4294958272 }
  0x4e   :  { %2363 = dma.done.wait [#allocation12], 1024  }
  0x4f   :  { %2364 = vsyncadd [#allocation12], 4294966272  ;;  %v2070_v0 = vld [vmem:[#allocation7 + $0x78] sm:$0xff]   ;;  %v2074_v4 = vld [vmem:[#allocation7 + $0x70] sm:$0xff]   ;;  %v2379_v23 = vmov 1983009808   ;;  %v139_v25 = vlaneseq }
  0x50   :  { %v2071_v1 = vld [vmem:[#allocation7 + $0x38] sm:$0xff]   ;;  %1861 = vmatprep.subr.bf16.mxu0 %v2070_v0  ;;  %v2075_v5 = vld [vmem:[#allocation7 + $0x30] sm:$0xff]   ;;  %v2078_v8 = vld [vmem:[#allocation7 + $0x68] sm:$0xff]   ;;  %v137_v24 = vunpack.c.l.s4 %v2379_v23  ;;  %vm1320_vm0 = vcmask 850944   ;;  %vm1324_vm1 = vcmask 1043456   ;;  %vm2382_vm2 = vmmov 0  }
  0x51   :  { %v2072_v2 = vld [vmem:[#allocation7 + $0xf8] sm:$0xff]   ;;  %1862 = vmatpush3.bf16.msra.mxu0 %v2071_v1  ;;  %v2076_v6 = vld [vmem:[#allocation7 + $0xf0] sm:$0xff]   ;;  %v2079_v9 = vld [vmem:[#allocation7 + $0x28] sm:$0xff]   ;;  %v140_v31 = vshrl.u32 %v139_v25, 7  ;;  %vm1708_vm3 = vcmask 23552  }
  0x52   :  { %v2073_v3 = vld [vmem:[#allocation7 + $0xb8] sm:$0xff]   ;;  %1883 = vmatprep.subr.bf16.mxu1 %v2072_v2  ;;  %1863 = vmatprep.subr.bf16.mxu0 %v2074_v4  ;;  %v2077_v7 = vld [vmem:[#allocation7 + $0xb0] sm:$0xff]   ;;  %v2080_v10 = vld [vmem:[#allocation7 + $0xe8] sm:$0xff]   ;;  %v138_v30 = vunpack.c.0.s8 %v137_v24 }
  0x53   :  { %1884 = vmatpush3.bf16.msra.mxu1 %v2073_v3  ;;  %v2081_v11 = vld [vmem:[#allocation7 + $0xa8] sm:$0xff]   ;;  %v2082_v12 = vld [vmem:[#allocation7 + $0x60] sm:$0xff]   ;;  %v2086_v16 = vld [vmem:[#allocation7 + $0x58] sm:$0xff]  }
  0x54   :  { %1885 = vmatprep.subr.bf16.mxu1 %v2076_v6  ;;  %v2083_v13 = vld [vmem:[#allocation7 + $0x20] sm:$0xff]   ;;  %v2087_v17 = vld [vmem:[#allocation7 + $0x18] sm:$0xff]   ;;  %v2090_v20 = vld [vmem:[#allocation7 + $0x50] sm:$0xff]   ;;  %v2466_v36 = vsub.s32 %v138_v30, %v140_v31 }
  0x55   :  { %1864 = vmatpush3.bf16.msra.mxu0 %v2075_v5  ;;  %v2084_v14 = vld [vmem:[#allocation7 + $0xe0] sm:$0xff]   ;;  %v2088_v18 = vld [vmem:[#allocation7 + $0xd8] sm:$0xff]   ;;  %v2091_v21 = vld [vmem:[#allocation7 + $0x10] sm:$0xff]  }
  0x56   :  { %1865 = vmatprep.subr.bf16.mxu0 %v2078_v8  ;;  %v2085_v15 = vld [vmem:[#allocation7 + $0xa0] sm:$0xff]   ;;  %v2089_v19 = vld [vmem:[#allocation7 + $0x98] sm:$0xff]   ;;  %v2092_v22 = vld [vmem:[#allocation7 + $0xd0] sm:$0xff]  }
  0x57   :  { %1886 = vmatpush3.bf16.msra.mxu1 %v2077_v7  ;;  %v2093_v26 = vld [vmem:[#allocation7 + $0x90] sm:$0xff]   ;;  %v2094_v27 = vld [vmem:[#allocation7 + $0x48] sm:$0xff]   ;;  %v2098_v33 = vld [vmem:[#allocation7 + $0x40] sm:$0xff]  }
  0x58   :  { %1887 = vmatprep.subr.bf16.mxu1 %v2080_v10  ;;  %v2095_v28 = vld [vmem:[#allocation7 + $0x8] sm:$0xff]   ;;  %v2099_v34 = vld [vmem:[#allocation7] sm:$0xff]   ;;  %v2101_v37 = vld [vmem:[#allocation2] ss:$12 sps:$4 sm:$0xff]  }
  0x59   :  { %1866 = vmatpush3.bf16.msra.mxu0 %v2079_v9  ;;  %v2096_v29 = vld [vmem:[#allocation7 + $0xc8] sm:$0xff]   ;;  %v2100_v35 = vld [vmem:[#allocation7 + $0xc0] sm:$0xff]   ;;  %v142_v40 = vrot.slane %v2101_v37, %v2466_v36  ;;  %v2106_v42 = vld [vmem:[#allocation7 + $0x178] sm:$0xff]  }
  0x5a   :  { %1867 = vmatprep.subr.bf16.mxu0 %v2082_v12  ;;  %v2097_v32 = vld [vmem:[#allocation7 + $0x88] sm:$0xff]   ;;  %v2105_v39 = vld [vmem:[#allocation7 + $0x80] sm:$0xff]   ;;  %v2110_v49 = vld [vmem:[#allocation8 + $0x78] sm:$0xff]  }
  0x5b   :  { %1888 = vmatpush3.bf16.msra.mxu1 %v2081_v11  ;;  %v2103_v38 = vld [vmem:[#allocation2 + $0x18] ss:$12 sps:$4 sm:$0xff]   ;;  %v2108_v44 = vld [vmem:[#allocation2 + $0x1c] ss:$12 sps:$4 sm:$0xff]   ;;  %v2120_v1 = vld [vmem:[#allocation7 + $0x160] sm:$0xff]  }
  0x5c   :  { %1889 = vmatprep.subr.bf16.mxu1 %v2084_v14  ;;  %v156_v41 = vrot.slane %v2103_v38, %v2466_v36  ;;  %v2107_v43 = vld [vmem:[#allocation2 + $0x4] ss:$12 sps:$4 sm:$0xff]   ;;  %v163_v48 = vrot.slane %v2108_v44, %v2466_v36  ;;  %v2109_v52 = vld [vmem:[#allocation7 + $0x138] sm:$0xff]   ;;  %v2116_v61 = vld [vmem:[#allocation7 + $0x168] sm:$0xff]  }
  0x5d   :  { %1868 = vmatpush3.bf16.msra.mxu0 %v2083_v13  ;;  %v149_v47 = vrot.slane %v2107_v43, %v2466_v36  ;;  %v2112_v55 = vld [vmem:[#allocation7 + $0x170] sm:$0xff]   ;;  %v2111_v56 = vld [vmem:[#allocation8 + $0x38] sm:$0xff]   ;;  %v2117_v63 = vld [vmem:[#allocation7 + $0x128] sm:$0xff]  }
  0x5e   :  { %1869 = vmatprep.subr.bf16.mxu0 %v2086_v16  ;;  %v165_v45 = vcombine.high %v142_v40, %v156_v41  ;;  %v164_v46 = vcombine.low %v142_v40, %v156_v41  ;;  %v2113_v59 = vld [vmem:[#allocation7 + $0x130] sm:$0xff]   ;;  %v2118_v0 = vld [vmem:[#allocation8 + $0x68] sm:$0xff]   ;;  %v2121_v3 = vld [vmem:[#allocation7 + $0x120] sm:$0xff]  }
  0x5f   :  { %1890 = vmatpush3.bf16.msra.mxu1 %v2085_v15  ;;  %v167_v53 = vcombine.high %v149_v47, %v163_v48  ;;  %v166_v54 = vcombine.low %v149_v47, %v163_v48  ;;  %v2114_v60 = vld [vmem:[#allocation8 + $0x70] sm:$0xff]   ;;  %v2119_v2 = vld [vmem:[#allocation8 + $0x28] sm:$0xff]   ;;  %v2122_v4 = vld [vmem:[#allocation8 + $0x60] sm:$0xff]  }
  0x60   :  { %1891 = vmatprep.subr.bf16.mxu1 %v2088_v18  ;;  %v193_v50 = vpack.c.bf16 %v165_v45, %v165_v45  ;;  %v192_v51 = vpack.c.bf16 %v164_v46, %v164_v46  ;;  %v2115_v62 = vld [vmem:[#allocation8 + $0x30] sm:$0xff]   ;;  %v2124_v5 = vld [vmem:[#allocation7 + $0x158] sm:$0xff]   ;;  %v2123_v6 = vld [vmem:[#allocation8 + $0x20] sm:$0xff]  }
  0x61   :  { %1870 = vmatpush3.bf16.msra.mxu0 %v2087_v17  ;;  %v195_v57 = vpack.c.bf16 %v167_v53, %v167_v53  ;;  %v194_v58 = vpack.c.bf16 %v166_v54, %v166_v54  ;;  %v2125_v7 = vld [vmem:[#allocation7 + $0x118] sm:$0xff]   ;;  %v2128_v9 = vld [vmem:[#allocation7 + $0x150] sm:$0xff]   ;;  %v2132_v13 = vld [vmem:[#allocation7 + $0x148] sm:$0xff]  }
  0x62   :  { %1871 = vmatprep.subr.bf16.mxu0 %v2090_v20  ;;  %725 = vmatprep.mubr.bf16.mxu0 %v193_v50  ;;  %v2126_v8 = vld [vmem:[#allocation8 + $0x58] sm:$0xff]   ;;  %v2129_v11 = vld [vmem:[#allocation7 + $0x110] sm:$0xff]   ;;  %v2133_v15 = vld [vmem:[#allocation7 + $0x108] sm:$0xff]  }
  0x63   :  { %1892 = vmatpush3.bf16.msra.mxu1 %v2089_v19  ;;  %765 = vmatprep.mubr.bf16.mxu1 %v195_v57  ;;  %v2127_v10 = vld [vmem:[#allocation8 + $0x18] sm:$0xff]   ;;  %v2130_v12 = vld [vmem:[#allocation8 + $0x50] sm:$0xff]   ;;  %v2134_v16 = vld [vmem:[#allocation8 + $0x48] sm:$0xff]  }
  0x64   :  { %1893 = vmatprep.subr.bf16.mxu1 %v2092_v22  ;;  %v2131_v14 = vld [vmem:[#allocation8 + $0x10] sm:$0xff]   ;;  %v2135_v17 = vld [vmem:[#allocation8 + $0x8] sm:$0xff]   ;;  %v2136_v18 = vld [vmem:[#allocation7 + $0x140] sm:$0xff]  }
  0x65   :  { %1872 = vmatpush3.bf16.msra.mxu0 %v2091_v21  ;;  %v2137_v19 = vld [vmem:[#allocation7 + $0x100] sm:$0xff]   ;;  %v2140_v22 = vld [vmem:[#allocation2 + $0x20] ss:$12 sps:$4 sm:$0xff]   ;;  %v2154_v46 = vld [vmem:[#allocation8 + $0xe8] sm:$0xff]  }
  0x66   :  { %1873 = vmatprep.subr.bf16.mxu0 %v2094_v27  ;;  %v2138_v20 = vld [vmem:[#allocation8 + $0x40] sm:$0xff]   ;;  %v183_v25 = vrot.slane %v2140_v22, %v2466_v36  ;;  %v2150_v38 = vld [vmem:[#allocation8 + $0xf0] sm:$0xff]   ;;  %v2149_v41 = vld [vmem:[#allocation8 + $0x138] sm:$0xff]  }
  0x67   :  { %1894 = vmatpush3.bf16.msra.mxu1 %v2093_v26  ;;  %v2139_v21 = vld [vmem:[#allocation2 + $0x8] ss:$12 sps:$4 sm:$0xff]   ;;  %v2144_v30 = vld [vmem:[#allocation5] ss:$16 sps:$4 sm:$0xff]   ;;  %v2155_v48 = vld [vmem:[#allocation8 + $0xa8] sm:$0xff]  }
  0x68   :  { %1895 = vmatprep.subr.bf16.mxu1 %v2096_v29  ;;  %v2141_v23 = vld [vmem:[#allocation8] sm:$0xff]   ;;  %v176_v24 = vrot.slane %v2139_v21, %v2466_v36  ;;  %v2142_v26 = vld [vmem:[#allocation8 + $0xf8] sm:$0xff]   ;;  %v2152_v45 = vld [vmem:[#allocation8 + $0x170] sm:$0xff]  }
  0x69   :  { %1874 = vmatpush3.bf16.msra.mxu0 %v2095_v28  ;;  %v2143_v29 = vld [vmem:[#allocation8 + $0xb8] sm:$0xff]   ;;  %v2146_v31 = vld [vmem:[#allocation5 + $0x20] ss:$16 sps:$4 sm:$0xff]  }
  0x6a   :  { %1875 = vmatprep.subr.bf16.mxu0 %v2098_v33  ;;  %v185_v27 = vcombine.high %v176_v24, %v183_v25  ;;  %v184_v28 = vcombine.low %v176_v24, %v183_v25  ;;  %v238_v37 = vrot.slane %v2146_v31, %v2466_v36  ;;  %v2153_v47 = vld [vmem:[#allocation8 + $0x130] sm:$0xff]   ;;  %v2158_v50 = vld [vmem:[#allocation8 + $0xe0] sm:$0xff]   ;;  %v2162_v54 = vld [vmem:[#allocation8 + $0xd8] sm:$0xff]  }
  0x6b   :  { %1896 = vmatpush3.bf16.msra.mxu1 %v2097_v32  ;;  %v2160_v53 = vld [vmem:[#allocation8 + $0x160] sm:$0xff]   ;;  %v2164_v57 = vld [vmem:[#allocation8 + $0x158] sm:$0xff]   ;;  %v2187_v31 = vld [vmem:[#allocation8 + $0x1b0] sm:$0xff]  }
  0x6c   :  { %1897 = vmatprep.subr.bf16.mxu1 %v2100_v35  ;;  %v197_v32 = vpack.c.bf16 %v185_v27, %v185_v27  ;;  %v196_v33 = vpack.c.bf16 %v184_v28, %v184_v28  ;;  %v224_v35 = vrot.slane %v2144_v30, %v2466_v36  ;;  %v2186_v24 = vld [vmem:[#allocation8 + $0x1b8] sm:$0xff]  }
  0x6d   :  { %1876 = vmatpush3.bf16.msra.mxu0 %v2099_v34  ;;  %v2148_v34 = vld [vmem:[#allocation8 + $0x178] sm:$0xff]  }
  0x6e   :  { %1905 = vmatprep.subr.bf16.mxu0 %v2106_v42  ;;  %v246_v40 = vcombine.low %v224_v35, %v238_v37  ;;  %v2151_v42 = vld [vmem:[#allocation8 + $0xb0] sm:$0xff]  }
  0x6f   :  { %1898 = vmatpush3.bf16.msra.mxu1 %v2105_v39  ;;  %v247_v39 = vcombine.high %v224_v35, %v238_v37  ;;  %v2192_v35 = vld [vmem:[#allocation8 + $0x188] sm:$0xff]   ;;  %v2193_v37 = vld [vmem:[#allocation8 + $0x180] sm:$0xff]  }
  0x70   :  { %1927 = vmatprep.subr.bf16.mxu1 %v2110_v49  ;;  %726 = vmatmul.mubr.bf16.vlgmr.msra.gmra.mxu0 %v192_v51  ;;  %v294_v44 = vpack.c.bf16 %v246_v40, %v246_v40  ;;  %v2156_v49 = vld [vmem:[#allocation8 + $0x168] sm:$0xff]  }
  0x71   :  { %1906 = vmatpush3.bf16.msra.mxu0 %v2109_v52  ;;  %805 = vmatprep.mubr.bf16.mxu0 %v197_v32  ;;  %v295_v43 = vpack.c.bf16 %v247_v39, %v247_v39  ;;  %v2157_v51 = vld [vmem:[#allocation8 + $0x128] sm:$0xff]   ;;  %v2159_v52 = vld [vmem:[#allocation8 + $0xa0] sm:$0xff]  }
  0x72   :  { %1907 = vmatprep.subr.bf16.mxu0 %v2112_v55  ;;  %766 = vmatmul.mubr.bf16.vlgmr.msra.gmra.mxu1 %v194_v58  ;;  %v2161_v55 = vld [vmem:[#allocation8 + $0x120] sm:$0xff]   ;;  %v2166_v58 = vld [vmem:[#allocation8 + $0xd0] sm:$0xff]   ;;  %v2195_v40 = vld [vmem:[#allocation8 + $0x1e8] sm:$0xff]  }
  0x73   :  { %1928 = vmatpush3.bf16.msra.mxu1 %v2111_v56  ;;  %1360 = vmatprep.mubr.bf16.mxu1 %v295_v43  ;;  %v2163_v56 = vld [vmem:[#allocation8 + $0x98] sm:$0xff]   ;;  %v2189_v32 = vld [vmem:[#allocation8 + $0x1a0] sm:$0xff]   ;;  %v2198_v43 = vld [vmem:[#allocation8 + $0x1d0] sm:$0xff]  }
  0x74   :  { %1929 = vmatprep.subr.bf16.mxu1 %v2114_v60  ;;  %v2167_v60 = vld [vmem:[#allocation8 + $0x90] sm:$0xff]  }
  0x75   :  { %1908 = vmatpush3.bf16.msra.mxu0 %v2113_v59  ;;  %v2165_v59 = vld [vmem:[#allocation8 + $0x118] sm:$0xff]  }
  0x76   :  { %1909 = vmatprep.subr.bf16.mxu0 %v2116_v61  ;;  %v2168_v61 = vld [vmem:[#allocation8 + $0x150] sm:$0xff]  }
  0x77   :  { %1930 = vmatpush3.bf16.msra.mxu1 %v2115_v62  ;;  %v2170_v62 = vld [vmem:[#allocation8 + $0xc8] sm:$0xff]  }
  0x78   :  { %1931 = vmatprep.subr.bf16.mxu1 %v2118_v0  ;;  %v2171_v0 = vld [vmem:[#allocation8 + $0x88] sm:$0xff]  }
  0x79   :  { %1910 = vmatpush3.bf16.msra.mxu0 %v2117_v63  ;;  %v2169_v63 = vld [vmem:[#allocation8 + $0x110] sm:$0xff]  }
  0x7a   :  { %1911 = vmatprep.subr.bf16.mxu0 %v2120_v1  ;;  %v2172_v1 = vld [vmem:[#allocation8 + $0x148] sm:$0xff]  }
  0x7b   :  { %1932 = vmatpush3.bf16.msra.mxu1 %v2119_v2  ;;  %v2174_v2 = vld [vmem:[#allocation8 + $0xc0] sm:$0xff]  }
  0x7c   :  { %1933 = vmatprep.subr.bf16.mxu1 %v2122_v4  ;;  %v2175_v4 = vld [vmem:[#allocation8 + $0x80] sm:$0xff]  }
  0x7d   :  { %1912 = vmatpush3.bf16.msra.mxu0 %v2121_v3  ;;  %v2173_v3 = vld [vmem:[#allocation8 + $0x108] sm:$0xff]  }
  0x7e   :  { %1913 = vmatprep.subr.bf16.mxu0 %v2124_v5  ;;  %v2177_v5 = vld [vmem:[#allocation5 + $0x4] ss:$16 sps:$4 sm:$0xff]  }
  0x7f   :  { %1934 = vmatpush3.bf16.msra.mxu1 %v2123_v6  ;;  %v2178_v6 = vld [vmem:[#allocation5 + $0x24] ss:$16 sps:$4 sm:$0xff]  }
  0x80   :  { %1935 = vmatprep.subr.bf16.mxu1 %v2126_v8  ;;  %v231_v8 = vrot.slane %v2177_v5, %v2466_v36 }
  0x81   :  { %1914 = vmatpush3.bf16.msra.mxu0 %v2125_v7  ;;  %v2176_v7 = vld [vmem:[#allocation8 + $0x140] sm:$0xff]  }
  0x82   :  { %1915 = vmatprep.subr.bf16.mxu0 %v2128_v9  ;;  %v245_v9 = vrot.slane %v2178_v6, %v2466_v36 }
  0x83   :  { %1936 = vmatpush3.bf16.msra.mxu1 %v2127_v10  ;;  %v2180_v10 = vld [vmem:[#allocation5 + $0x8] ss:$16 sps:$4 sm:$0xff]  }
  0x84   :  { %1937 = vmatprep.subr.bf16.mxu1 %v2130_v12  ;;  %v2183_v12 = vld [vmem:[#allocation5 + $0x28] ss:$16 sps:$4 sm:$0xff]  }
  0x85   :  { %1916 = vmatpush3.bf16.msra.mxu0 %v2129_v11  ;;  %v2182_v11 = vld [vmem:[#allocation5 + $0xc] ss:$16 sps:$4 sm:$0xff]  }
  0x86   :  { %1917 = vmatprep.subr.bf16.mxu0 %v2132_v13  ;;  %v2185_v13 = vld [vmem:[#allocation5 + $0x2c] ss:$16 sps:$4 sm:$0xff]  }
  0x87   :  { %1938 = vmatpush3.bf16.msra.mxu1 %v2131_v14  ;;  %v249_v14 = vcombine.high %v231_v8, %v245_v9  ;;  %v281_v21 = vrot.slane %v2185_v13, %v2466_v36 }
  0x88   :  { %1939 = vmatprep.subr.bf16.mxu1 %v2134_v16  ;;  %v248_v16 = vcombine.low %v231_v8, %v245_v9 }
  0x89   :  { %1918 = vmatpush3.bf16.msra.mxu0 %v2133_v15  ;;  %v2179_v15 = vld [vmem:[#allocation8 + $0x100] sm:$0xff]   ;;  %v297_v22 = vpack.c.bf16 %v249_v14, %v249_v14 }
  0x8a   :  { %1919 = vmatprep.subr.bf16.mxu0 %v2136_v18  ;;  %v260_v18 = vrot.slane %v2180_v10, %v2466_v36 }
  0x8b   :  { %1940 = vmatpush3.bf16.msra.mxu1 %v2135_v17  ;;  %v2380_v17 = vmov 0  }
  0x8c   :  { %1941 = vmatprep.subr.bf16.mxu1 %v2138_v20  ;;  %v267_v20 = vrot.slane %v2182_v11, %v2466_v36 }
  0x8d   :  { %1920 = vmatpush3.bf16.msra.mxu0 %v2137_v19  ;;  %v274_v19 = vrot.slane %v2183_v12, %v2466_v36  ;;  %v2188_v36 = vld [vmem:[#allocation8 + $0x1a8] sm:$0xff]  }
  0x8e   :  { %1949 = vmatprep.subr.bf16.mxu0 %v2142_v26  ;;  %v285_v27 = vcombine.high %v267_v20, %v281_v21 }
  0x8f   :  { %1942 = vmatpush3.bf16.msra.mxu1 %v2141_v23  ;;  %v296_v23 = vpack.c.bf16 %v248_v16, %v248_v16  ;;  %v283_v25 = vcombine.high %v260_v18, %v274_v19  ;;  %v282_v26 = vcombine.low %v260_v18, %v274_v19 }
  0x90   :  { %1971 = vmatprep.subr.bf16.mxu1 %v2148_v34  ;;  %806 = vmatmul.mubr.bf16.vlgmr.msra.gmra.mxu0 %v196_v33  ;;  %v301_v30 = vpack.c.bf16 %v285_v27, %v285_v27  ;;  %v2190_v33 = vld [vmem:[#allocation8 + $0x198] sm:$0xff]   ;;  %v2191_v34 = vld [vmem:[#allocation8 + $0x190] sm:$0xff]  }
  0x91   :  { %1950 = vmatpush3.bf16.msra.mxu0 %v2143_v29  ;;  %1400 = vmatprep.mubr.bf16.mxu0 %v297_v22  ;;  %v299_v28 = vpack.c.bf16 %v283_v25, %v283_v25  ;;  %v298_v29 = vpack.c.bf16 %v282_v26, %v282_v26  ;;  %v1779_v25 = vld [vmem:[%s2534_s5] ss:$0 sm:$0xff] }
  0x92   :  { %1951 = vmatprep.subr.bf16.mxu0 %v2150_v38  ;;  %1361 = vmatmul.mubr.bf16.vlgmr.msra.gmra.mxu1 %v294_v44  ;;  %v2194_v38 = vld [vmem:[#allocation8 + $0x1f0] ss:$0 sps:$4 sm:$0xff]   ;;  %v2199_v44 = vld [vmem:[#allocation8 + $0x1c8] sm:$0xff]  }
  0x93   :  { %1972 = vmatpush3.bf16.msra.mxu1 %v2149_v41  ;;  %1440 = vmatprep.mubr.bf16.mxu1 %v299_v28  ;;  %v1326_v39 = vsel %vm1324_vm1, %v2194_v38, 0  ;;  %v2196_v41 = vld [vmem:[#allocation8 + $0x1e0] sm:$0xff]  }
  0x94   :  { %1973 = vmatprep.subr.bf16.mxu1 %v2152_v45  ;;  %v284_v45 = vcombine.low %v267_v20, %v281_v21 }
  0x95   :  { %1952 = vmatpush3.bf16.msra.mxu0 %v2151_v42  ;;  %v2197_v42 = vld [vmem:[#allocation8 + $0x1d8] sm:$0xff]  }
  0x96   :  { %1953 = vmatprep.subr.bf16.mxu0 %v2154_v46  ;;  %v2200_v46 = vld [vmem:[#allocation8 + $0x1c0] sm:$0xff]  }
  0x97   :  { %1974 = vmatpush3.bf16.msra.mxu1 %v2153_v47  ;;  %v300_v47 = vpack.c.bf16 %v284_v45, %v284_v45  ;;  %v2216_v45 = vld [vmem:[#allocation10] sm:$0xff]  }
  0x98   :  { %1975 = vmatprep.subr.bf16.mxu1 %v2156_v49  ;;  %v2381_v49 = vmov 0.0  }
  0x99   :  { %1954 = vmatpush3.bf16.msra.mxu0 %v2155_v48  ;;  %v2201_v48 = vld [vmem:[#allocation11 + $0x38] sm:$0xff]  }
  0x9a   :  { %1955 = vmatprep.subr.bf16.mxu0 %v2158_v50  ;;  %v2202_v50 = vld [vmem:[#allocation11 + $0x30] sm:$0xff]  }
  0x9b   :  { %1976 = vmatpush3.bf16.msra.mxu1 %v2157_v51  ;;  %v2203_v51 = vld [vmem:[#allocation11 + $0x28] sm:$0xff]  }
  0x9c   :  { %1977 = vmatprep.subr.bf16.mxu1 %v2160_v53  ;;  %v2205_v53 = vld [vmem:[#allocation11 + $0x18] sm:$0xff]  }
  0x9d   :  { %1956 = vmatpush3.bf16.msra.mxu0 %v2159_v52  ;;  %v2204_v52 = vld [vmem:[#allocation11 + $0x20] sm:$0xff]  }
  0x9e   :  { %1957 = vmatprep.subr.bf16.mxu0 %v2162_v54  ;;  %v2206_v54 = vld [vmem:[#allocation11 + $0x10] sm:$0xff]  }
  0x9f   :  { %1978 = vmatpush3.bf16.msra.mxu1 %v2161_v55  ;;  %v2207_v55 = vld [vmem:[#allocation11 + $0x8] sm:$0xff]  }
  0xa0   :  { %1979 = vmatprep.subr.bf16.mxu1 %v2164_v57  ;;  %v1730_v57 = vld [vmem:[%s2532_s3] ss:$0 sm:$0xff] }
  0xa1   :  { %1958 = vmatpush3.bf16.msra.mxu0 %v2163_v56 }
  0xa2   :  { %1959 = vmatprep.subr.bf16.mxu0 %v2166_v58 }
  0xa3   :  { %1980 = vmatpush3.bf16.msra.mxu1 %v2165_v59 }
  0xa4   :  { %1981 = vmatprep.subr.bf16.mxu1 %v2168_v61 }
  0xa5   :  { %1960 = vmatpush3.bf16.msra.mxu0 %v2167_v60 }
  0xa6   :  { %1961 = vmatprep.subr.bf16.mxu0 %v2170_v62  ;;  %v2208_v62 = vld [vmem:[#allocation11] sm:$0xff]  }
  0xa7   :  { %1982 = vmatpush3.bf16.msra.mxu1 %v2169_v63 }
  0xa8   :  { %1983 = vmatprep.subr.bf16.mxu1 %v2172_v1 }
  0xa9   :  { %1962 = vmatpush3.bf16.msra.mxu0 %v2171_v0 }
  0xaa   :  { %1963 = vmatprep.subr.bf16.mxu0 %v2174_v2 }
  0xab   :  { %1984 = vmatpush3.bf16.msra.mxu1 %v2173_v3 }
  0xac   :  { %1985 = vmatprep.subr.bf16.mxu1 %v2176_v7 }
  0xad   :  { %1964 = vmatpush3.bf16.msra.mxu0 %v2175_v4 }
  0xae   :  { %1448 = vmatprep.subr.bf16.mxu0 %v2380_v17 }
  0xaf   :  { %1986 = vmatpush3.bf16.msra.mxu1 %v2179_v15 }
  0xb0   :  { %1401 = vmatmul.mubr.bf16.vlgmr.msra.gmra.mxu0 %v296_v23  ;;  %2011 = vmatprep.subr.bf16.mxu1 %v2381_v49 }
  0xb1   :  { %1449 = vmatpush1.bf16.msra.mxu0 %v2186_v24  ;;  %1843 = vmatprep.mubr.msk.bf16.mxu0 %vm1320_vm0, %v301_v30 }
  0xb2   :  { %1450 = vmatprep.subr.bf16.mxu0 %v2380_v17  ;;  %1441 = vmatmul.mubr.bf16.vlgmr.msra.gmra.mxu1 %v298_v29 }
  0xb3   :  { %2012 = vmatpush3.bf16.msra.mxu1 %v2201_v48  ;;  %2027 = vmatprep.mubr.msk.bf16.mxu1 %vm2382_vm2, %v2381_v49 }
  0xb4   :  { %2013 = vmatprep.subr.bf16.mxu1 %v2381_v49 }
  0xb5   :  { %1451 = vmatpush1.bf16.msra.mxu0 %v2187_v31 }
  0xb6   :  { %1452 = vmatprep.subr.bf16.mxu0 %v2380_v17 }
  0xb7   :  { %2014 = vmatpush3.bf16.msra.mxu1 %v2202_v50 }
  0xb8   :  { %2015 = vmatprep.subr.bf16.mxu1 %v2381_v49 }
  0xb9   :  { %1453 = vmatpush1.bf16.msra.mxu0 %v2188_v36 }
  0xba   :  { %1454 = vmatprep.subr.bf16.mxu0 %v2380_v17 }
  0xbb   :  { %2016 = vmatpush3.bf16.msra.mxu1 %v2203_v51 }
  0xbc   :  { %2017 = vmatprep.subr.bf16.mxu1 %v2381_v49 }
  0xbd   :  { %1455 = vmatpush1.bf16.msra.mxu0 %v2189_v32 }
  0xbe   :  { %1456 = vmatprep.subr.bf16.mxu0 %v2380_v17 }
  0xbf   :  { %2018 = vmatpush3.bf16.msra.mxu1 %v2204_v52 }
  0xc0   :  { %2019 = vmatprep.subr.bf16.mxu1 %v2381_v49 }
  0xc1   :  { %1457 = vmatpush1.bf16.msra.mxu0 %v2190_v33 }
  0xc2   :  { %1458 = vmatprep.subr.bf16.mxu0 %v2380_v17 }
  0xc3   :  { %2020 = vmatpush3.bf16.msra.mxu1 %v2205_v53 }
  0xc4   :  { %2021 = vmatprep.subr.bf16.mxu1 %v2381_v49 }
  0xc5   :  { %1459 = vmatpush1.bf16.msra.mxu0 %v2191_v34 }
  0xc6   :  { %1460 = vmatprep.subr.bf16.mxu0 %v2380_v17 }
  0xc7   :  { %2022 = vmatpush3.bf16.msra.mxu1 %v2206_v54  ;;  %v1860_v54 = vld [vmem:[%s2537_s8] ss:$0 sm:$0xff] }
  0xc8   :  { %2023 = vmatprep.subr.bf16.mxu1 %v2381_v49 }
  0xc9   :  { %1461 = vmatpush1.bf16.msra.mxu0 %v2192_v35  ;;  %v2209_v35 = vld [vmem:[#allocation10 + $0x38] sm:$0xff]  }
  0xca   :  { %1462 = vmatprep.subr.bf16.mxu0 %v2380_v17 }
  0xcb   :  { %2024 = vmatpush3.bf16.msra.mxu1 %v2207_v55 }
  0xcc   :  { %2025 = vmatprep.subr.bf16.mxu1 %v2381_v49 }
  0xcd   :  { %1463 = vmatpush1.bf16.msra.mxu0 %v2193_v37 }
  0xce   :  { %1466 = vmatprep.subr.bf16.mxu0 %v2380_v17 }
  0xcf   :  { %2026 = vmatpush3.bf16.msra.mxu1 %v2208_v62 }
  0xd0   :  { %2031 = vmatprep.subr.bf16.mxu1 %v2381_v49 }
  0xd1   :  { %1467 = vmatpush2.bf16.msra.mxu0 %v1326_v39  ;;  %v2210_v39 = vld [vmem:[#allocation10 + $0x30] sm:$0xff]  }
  0xd2   :  { %1468 = vmatprep.subr.bf16.mxu0 %v2380_v17 }
  0xd5   :  { %1469 = vmatpush2.bf16.msra.mxu0 %v2195_v40  ;;  %v2211_v40 = vld [vmem:[#allocation10 + $0x28] sm:$0xff]  }
  0xd6   :  { %1470 = vmatprep.subr.bf16.mxu0 %v2380_v17 }
  0xd9   :  { %1471 = vmatpush2.bf16.msra.mxu0 %v2196_v41  ;;  %v2212_v41 = vld [vmem:[#allocation10 + $0x20] sm:$0xff]  }
  0xda   :  { %1472 = vmatprep.subr.bf16.mxu0 %v2380_v17 }
  0xdd   :  { %1473 = vmatpush2.bf16.msra.mxu0 %v2197_v42  ;;  %v2213_v42 = vld [vmem:[#allocation10 + $0x18] sm:$0xff]  }
  0xde   :  { %1474 = vmatprep.subr.bf16.mxu0 %v2380_v17 }
  0xe1   :  { %1475 = vmatpush2.bf16.msra.mxu0 %v2198_v43  ;;  %v2214_v43 = vld [vmem:[#allocation10 + $0x10] sm:$0xff]  }
  0xe2   :  { %1476 = vmatprep.subr.bf16.mxu0 %v2380_v17 }
  0xe5   :  { %1477 = vmatpush2.bf16.msra.mxu0 %v2199_v44  ;;  %v2215_v44 = vld [vmem:[#allocation10 + $0x8] sm:$0xff]  }
  0xe6   :  { %1478 = vmatprep.subr.bf16.mxu0 %v2380_v17 }
  0xe9   :  { %1479 = vmatpush2.bf16.msra.mxu0 %v2200_v46 }
  0xec   :  { %1481 = vmatmul.mubr.bf16.vlgmr.msra.gmra.mxu0 %v300_v47 }
 0x130   :  { %v1877_v56 = vpop.f32.mrf.mxu0 }
 0x132   :  { %v1878_v58 = vpop.f32.mrf.mxu0  ;;  %v1899_v60 = vpop.f32.mrf.mxu1 }
 0x133   :  { %v1879_v59 = vadd.f32 %v1878_v58, %v1877_v56 }
 0x134   :  { %v1880_v61 = vpop.f32.mrf.mxu0  ;;  %v1900_v0 = vpop.f32.mrf.mxu1 }
 0x135   :  { %v728_v63 = vadd.f32 %v1879_v59, %v1730_v57  ;;  %v1901_v1 = vadd.f32 %v1900_v0, %v1899_v60 }
 0x136   :  { %v1881_v2 = vpop.f32.mrf.mxu0  ;;  %v1902_v3 = vpop.f32.mrf.mxu1 }
 0x137   :  { %v768_v4 = vadd.f32 %v1901_v1, %v728_v63 }
 0x138   :  { %v1903_v5 = vpop.f32.mrf.mxu1 }
 0x150   :  { %v1921_v6 = vpop.f32.mrf.mxu0 }
 0x152   :  { %v1922_v7 = vpop.f32.mrf.mxu0  ;;  %v1943_v11 = vpop.f32.mrf.mxu1 }
 0x153   :  { %v1923_v8 = vadd.f32 %v1922_v7, %v1921_v6 }
 0x154   :  { %v1924_v9 = vpop.f32.mrf.mxu0  ;;  %v1944_v13 = vpop.f32.mrf.mxu1 }
 0x155   :  { %v808_v10 = vadd.f32 %v1923_v8, %v768_v4  ;;  %v1945_v14 = vadd.f32 %v1944_v13, %v1943_v11 }
 0x156   :  { %v1925_v12 = vpop.f32.mrf.mxu0  ;;  %v1946_v15 = vpop.f32.mrf.mxu1 }
 0x157   :  { %v1363_v26 = vadd.f32 %v1945_v14, %v1779_v25  ;;  %v1488_v46 = vmax.f32 %v808_v10, 0.0 }
 0x158   :  { %v1947_v16 = vpop.f32.mrf.mxu1 }
 0x159   :  { %v1489_v47 = vpack.c.bf16 %v1488_v46, %v1488_v46 }
 0x170   :  { %v1965_v17 = vpop.f32.mrf.mxu0 }
 0x172   :  { %v1966_v18 = vpop.f32.mrf.mxu0  ;;  %v1987_v19 = vpop.f32.mrf.mxu1 }
 0x173   :  { %v1967_v27 = vadd.f32 %v1966_v18, %v1965_v17 }
 0x174   :  { %v1968_v20 = vpop.f32.mrf.mxu0  ;;  %v1988_v21 = vpop.f32.mrf.mxu1 }
 0x175   :  { %v1403_v28 = vadd.f32 %v1967_v27, %v1363_v26  ;;  %v1989_v29 = vadd.f32 %v1988_v21, %v1987_v19 }
 0x176   :  { %v1969_v22 = vpop.f32.mrf.mxu0  ;;  %v1990_v23 = vpop.f32.mrf.mxu1 }
 0x177   :  { %v1443_v30 = vadd.f32 %v1989_v29, %v1403_v28 }
 0x178   :  { %v1991_v24 = vpop.f32.mrf.mxu1 }
 0x1ac   :  { %v1482_v31 = vpop.f32.mrf.mxu0 }
 0x1ad   :  { %v1483_v36 = vadd.f32 %v1482_v31, %v1443_v30 }
 0x1ae   :  { %v1484_v32 = vpop.f32.mrf.mxu0 }
 0x1af   :  { %v1490_v33 = vmax.f32 %v1483_v36, 0.0 }
 0x1b0   :  { %v1485_v34 = vpop.f32.mrf.mxu0 }
 0x1b1   :  { %v1491_v37 = vpack.c.bf16 %v1490_v33, %v1490_v33 }
 0x1b2   :  { %v1486_v38 = vpop.f32.mrf.mxu0 }
 0x1b3   :  { %2028 = vmatmul.mubr.bf16.vlgmr.msra.gmra.mxu1 %v1491_v37 }
 0x1b4   :  { %2032 = vmatpush3.bf16.msra.mxu1 %v2209_v35  ;;  %2047 = vmatprep.mubr.msk.bf16.mxu1 %vm2382_vm2, %v2381_v49 }
 0x1b5   :  { %2033 = vmatprep.subr.bf16.mxu1 %v2381_v49 }
 0x1b8   :  { %2034 = vmatpush3.bf16.msra.mxu1 %v2210_v39 }
 0x1b9   :  { %2035 = vmatprep.subr.bf16.mxu1 %v2381_v49 }
 0x1bc   :  { %2036 = vmatpush3.bf16.msra.mxu1 %v2211_v40 }
 0x1bd   :  { %2037 = vmatprep.subr.bf16.mxu1 %v2381_v49 }
 0x1c0   :  { %2038 = vmatpush3.bf16.msra.mxu1 %v2212_v41 }
 0x1c1   :  { %2039 = vmatprep.subr.bf16.mxu1 %v2381_v49 }
 0x1c4   :  { %2040 = vmatpush3.bf16.msra.mxu1 %v2213_v42 }
 0x1c5   :  { %2041 = vmatprep.subr.bf16.mxu1 %v2381_v49 }
 0x1c8   :  { %2042 = vmatpush3.bf16.msra.mxu1 %v2214_v43 }
 0x1c9   :  { %2043 = vmatprep.subr.bf16.mxu1 %v2381_v49 }
 0x1cc   :  { %2044 = vmatpush3.bf16.msra.mxu1 %v2215_v44 }
 0x1cd   :  { %2045 = vmatprep.subr.bf16.mxu1 %v2381_v49 }
 0x1d0   :  { %2046 = vmatpush3.bf16.msra.mxu1 %v2216_v45 }
 0x1d3   :  { %2048 = vmatmul.mubr.bf16.vlgmr.msra.gmra.mxu1 %v1489_v47 }
 0x273   :  { %v1606_v48 = vpop.f32.mrf.mxu1 }
 0x275   :  { %v2029_v50 = vpop.f32.mrf.mxu1 }
 0x277   :  { %v1609_v51 = vpop.f32.mrf.mxu1 }
 0x279   :  { %v2030_v52 = vpop.f32.mrf.mxu1 }
 0x293   :  { %v1694_v53 = vpop.f32.mrf.mxu1 }
 0x294   :  { %v1695_v55 = vadd.f32 %v1694_v53, %v1606_v48 }
 0x295   :  { %v2049_v56 = vpop.f32.mrf.mxu1 }
 0x296   :  { %v1707_v57 = vadd.f32 %v1860_v54, %v1695_v55 }
 0x297   :  { %v1697_v58 = vpop.f32.mrf.mxu1 }
 0x298   :  { %1709 = vst.msk [vmem:[#allocation13] sm:$0xff] %vm1708_vm3, %v1707_v57 }
 0x299   :  { %v2050_v59 = vpop.f32.mrf.mxu1 }
 0x29a   :  { %1714 = vsyncadd [#allocation4], 96  ;;  %s2383_s24 = smov [#allocation13]  }
 0x29b   :  { %s1715_s25 = sshll.u32 %s2383_s24, 4  ;;  %s1716_s25 = int_to_ptr.vmem [resolvable:$true] %s1715_s25 }
 0x29c   :  { %s2337_s0 = scalar_lea.vmem %s1716_s25, 32  ;;  %s2341_s26 = scalar_lea.vmem %s1716_s25, 128 }
 0x29d   :  { %p2338_p2 = scmp.ne.s32.totalorder %s1716_s25, %s2337_s0  ;;  %p2342_p3 = scmp.lt.s32.totalorder %s1716_s25, %s1716_s25 }
 0x29e   :  { %p2343_p4 = scmp.lt.s32.totalorder %s2341_s26, %s2337_s0 }
 0x2a0   :  { %p2344_p5 = por %p2343_p4, %p2342_p3 }
 0x2a2   :  { %p2345_p6 = pnand %p2344_p5, %p2338_p2 }
 0x2a4   :  { %2348 = shalt.err (!%p2345_p6)
}
 0x2a5   :  { %s2384_s8 = smov 32   ;;  %s2385_s27 = smov 2  }
 0x2a6   :  { %1721 = dma.vmem_to_hbm [thread:$0]  %s1716_s25, 32, %s2538_s9, [#allocation4], %s2384_s8, %s2384_s8, %s2385_s27  }
 0x2a7   :  { %2365 = dma.done.wait [#allocation4], 128  }
 0x2a8   :  { %2366 = vsyncadd [#allocation4], 4294967168 }
 0x2a9   :  { %1725 = vsyncpa [#allocation3], 1 }
 0x2aa   :  { %1726 = vsyncpa [#allocation6], 1 }
 0x2ab   :  { %1727 = vsyncpa [#allocation9], 1 }
 0x2ac   :  { %1728 = vsyncpa [#allocation12], 1 }
 0x2ad   :  { %1729 = vsyncpa [#allocation4], 1 }

</bundles_post_ra>
